<compile_context>
chip_gen: v7x
topology: tpu7x:2x2x1
jax: 0.10.0
libtpu: 0.0.40
codegen_flags: <defaults>
</compile_context>

<pallas_src>
import functools

import jax
import jax.numpy as jnp
from jax import lax
from jax.experimental import pallas as pl
from jax.experimental.pallas import tpu as pltpu


def _intent_classifier_kernel(x_ref, w_ref, b_ref, o_ref):
    # x_ref: [TB, D], w_ref: [N, D] (PyTorch layout), b_ref: [1, N], o_ref: [TB, N]
    # Dropout(p=0.0) is the identity, so the hot path is just the affine map.
    x = x_ref[...]
    w = w_ref[...]
    # Contract x's dim 1 (D) with w's dim 1 (D): [TB, D] x [N, D] -> [TB, N].
    acc = lax.dot_general(
        x, w,
        dimension_numbers=(((1,), (1,)), ((), ())),
        preferred_element_type=jnp.float32,
    )
    # Bias read once per grid step; f32 add, single cast at store.
    b = b_ref[...].astype(jnp.float32)
    o_ref[...] = (acc + b).astype(o_ref.dtype)


@functools.partial(jax.jit, static_argnames=("block_rows",))
def intent_classifier_forward(x, weight, bias, *, block_rows=512):
    """x: [B, D]; weight: [N, D] (PyTorch layout); bias: [N]."""
    B, D = x.shape
    N = weight.shape[0]

    # Batch tile: as large as reasonable.  If the tile does not cover the full
    # batch, keep it a multiple of 8 for the (8,128) block-shape rule.
    tb = min(block_rows, B)
    if tb != B:
        tb = max(8, (tb // 8) * 8)
    grid = (pl.cdiv(B, tb),)

    b2 = bias.reshape(1, N)  # 2-D for TPU-friendly (sublane, lane) layout

    return pl.pallas_call(
        _intent_classifier_kernel,
        out_shape=jax.ShapeDtypeStruct((B, N), x.dtype),
        grid=grid,
        in_specs=[
            # x: tiled over batch (double-buffered / prefetched by Pallas).
            pl.BlockSpec((tb, D), lambda i: (i, 0)),
            # weight: constant index_map -> DMA'd once, VMEM-resident across steps.
            pl.BlockSpec((N, D), lambda i: (0, 0)),
            # bias: constant index_map, VMEM-resident.
            pl.BlockSpec((1, N), lambda i: (0, 0)),
        ],
        out_specs=pl.BlockSpec((tb, N), lambda i: (i, 0)),
        compiler_params=pltpu.CompilerParams(
            # Rows are independent -> parallel (shards across v7x's 2 TCs).
            dimension_semantics=("parallel",),
            # Headroom for big TB / D tiles; still conservative for v7x (64 MiB).
            vmem_limit_bytes=48 * 1024 * 1024,
        ),
    )(x, weight, b2)


if __name__ == "__main__":
    # Small shapes consistent with the module: batch=2, input_dim=32, labels=8.
    B, D, N = 2, 32, 8

    key = jax.random.PRNGKey(0)
    kx, kw, kb = jax.random.split(key, 3)

    x = jax.random.normal(kx, (B, D), dtype=jnp.float32)
    # Deterministic parameter init mimicking nn.Linear's default uniform range.
    bound = 1.0 / (D ** 0.5)
    weight = jax.random.uniform(kw, (N, D), minval=-bound, maxval=bound,
                                dtype=jnp.float32)
    bias = jax.random.uniform(kb, (N,), minval=-bound, maxval=bound,
                              dtype=jnp.float32)

    out = intent_classifier_forward(x, weight, bias)
    jax.block_until_ready(out)

    # Reference check in plain JAX (dropout p=0.0 is identity).
    ref = x @ weight.T + bias
    assert out.shape == (B, N)
    assert jnp.allclose(out, ref, atol=1e-5, rtol=1e-5)

    print("KERNEL_OK")
</pallas_src>

<mosaic_0001>
module attributes {stable_mosaic.version = 11 : i64} {
  func.func @_intent_classifier_kernel(%arg0: i32, %arg1: memref<2x32xf32, #tpu.memory_space<vmem>>, %arg2: memref<8x32xf32, #tpu.memory_space<vmem>>, %arg3: memref<1x8xf32, #tpu.memory_space<vmem>>, %arg4: memref<2x8xf32, #tpu.memory_space<vmem>>) attributes {dimension_semantics = [#tpu.dimension_semantics<parallel>], iteration_bounds = array<i64: 1>, scalar_prefetch = 0 : i64, scratch_operands = 0 : i64, tpu.core_type = #tpu.core_type<tc>, window_params = [{transform_indices = @transform_0, window_bounds = array<i64: 2, 32>}, {pipeline_mode = #tpu.pipeline_mode<synchronous>, transform_indices = @transform_1, window_bounds = array<i64: 8, 32>}, {pipeline_mode = #tpu.pipeline_mode<synchronous>, transform_indices = @transform_2, window_bounds = array<i64: 1, 8>}, {transform_indices = @transform_3, window_bounds = array<i64: 2, 8>}]} {
    %c0 = arith.constant 0 : index
    %c0_0 = arith.constant 0 : index
    %0 = vector.load %arg1[%c0, %c0_0] : memref<2x32xf32, #tpu.memory_space<vmem>>, vector<2x32xf32>
    %c0_1 = arith.constant 0 : index
    %c0_2 = arith.constant 0 : index
    %1 = vector.load %arg2[%c0_1, %c0_2] : memref<8x32xf32, #tpu.memory_space<vmem>>, vector<8x32xf32>
    %cst = arith.constant dense<0.000000e+00> : vector<2x8xf32>
    %2 = tpu.matmul %0, %1, %cst {dimension_numbers = #tpu.dot_dimension_numbers<[1], [1], [0], [0], [0, 0, 1, 0], [], []>} : vector<2x32xf32>, vector<8x32xf32>, vector<2x8xf32> -> vector<2x8xf32>
    %c0_3 = arith.constant 0 : index
    %c0_4 = arith.constant 0 : index
    %3 = vector.load %arg3[%c0_3, %c0_4] : memref<1x8xf32, #tpu.memory_space<vmem>>, vector<1x8xf32>
    %4 = vector.broadcast %3 : vector<1x8xf32> to vector<2x8xf32>
    %5 = arith.addf %2, %4 : vector<2x8xf32>
    %c0_5 = arith.constant 0 : index
    %c0_6 = arith.constant 0 : index
    %6 = vector.load %arg4[%c0_5, %c0_6] : memref<2x8xf32, #tpu.memory_space<vmem>>, vector<2x8xf32>
    tpu.vector_store %arg4[%c0_5, %c0_6], %5 {strides = array<i32>} : memref<2x8xf32, #tpu.memory_space<vmem>>, vector<2x8xf32>,
    return
  }
  func.func @transform_0(%arg0: i32) -> (i32, i32) {
    %c0_i32 = arith.constant 0 : i32
    %c0_i32_0 = arith.constant 0 : i32
    return %arg0, %c0_i32 : i32, i32
  }
  func.func @transform_1(%arg0: i32) -> (i32, i32) {
    %c0_i32 = arith.constant 0 : i32
    %c0_i32_0 = arith.constant 0 : i32
    %c0_i32_1 = arith.constant 0 : i32
    return %c0_i32, %c0_i32_0 : i32, i32
  }
  func.func @transform_2(%arg0: i32) -> (i32, i32) {
    %c0_i32 = arith.constant 0 : i32
    %c0_i32_0 = arith.constant 0 : i32
    %c0_i32_1 = arith.constant 0 : i32
    return %c0_i32, %c0_i32_0 : i32, i32
  }
  func.func @transform_3(%arg0: i32) -> (i32, i32) {
    %c0_i32 = arith.constant 0 : i32
    %c0_i32_0 = arith.constant 0 : i32
    return %arg0, %c0_i32 : i32, i32
  }
}

</mosaic_0001>

<bundles_post_ra>
// kernel: intent_classifier_forward.1
= control target key start
LH: loop header
LB: loop body
LE: loop exit
PB: predicated region body
PF: predicated region fallthrough
CT: control target
= control target key end

     0   :  { %8 = vsyncpa [#allocation3], 0  ;;  %s246_s0 = inlined_call_operand.vmem [shape: f32[2,32], index: 0, kind: input, shape index: {}]   ;;  %s247_s1 = inlined_call_operand.hbm [shape: f32[8,32], index: 1, kind: input, shape index: {}]   ;;  %s248_s2 = inlined_call_operand.vmem [shape: f32[1,8], index: 2, kind: input, shape index: {}]   ;;  %s249_s3 = inlined_call_operand.hbm [shape: f32[2,8], index: 3, kind: output, shape index: {}]  }
   0x1   :  { %9 = vsyncpa [#allocation4], 0  ;;  %s192_s12 = smov [#allocation2]   ;;  %s144_s16 = scalar_lea.hbm %s247_s1, 128 }
   0x2   :  { %s18_s13 = sshll.u32 %s192_s12, 4  ;;  %p145_p0 = scmp.ne.s32.totalorder %s247_s1, %s144_s16  ;;  %s19_s13 = int_to_ptr.vmem [resolvable:$true] %s18_s13 }
   0x3   :  { %p148_p1 = scmp.lt.u32.totalorder %s144_s16, %s247_s1 }
   0x5   :  { %p150_p2 = pnand %p148_p1, %p145_p0 }
   0x7   :  { %153 = shalt.err (!%p150_p2)
}
   0x8   :  { %s154_s21 = scalar_lea.vmem %s19_s13, 128  ;;  %p159_p4 = scmp.lt.s32.totalorder %s19_s13, %s19_s13 }
   0x9   :  { %p155_p3 = scmp.ne.s32.totalorder %s19_s13, %s154_s21  ;;  %p160_p5 = scmp.lt.s32.totalorder %s154_s21, %s154_s21 }
   0xb   :  { %p161_p6 = por %p160_p5, %p159_p4 }
   0xd   :  { %p162_p7 = pnand %p161_p6, %p155_p3 }
   0xf   :  { %165 = shalt.err (!%p162_p7)
}
  0x10   :  { %21 = dma.hbm_to_vmem [thread:$0]  %s247_s1, 128, %s19_s13, [#allocation3]  }
  0x11   :  { %188 = dma.done.wait [#allocation3], 128  }
  0x12   :  { %189 = vsyncadd [#allocation3], 4294967168  ;;  %v193_v0 = vmov 0.0   ;;  %vm194_vm0 = vmmov 0   ;;  %vm36_vm1 = vcmask 261120   ;;  %v28_v1 = vld [vmem:[#allocation2] sm:$0xff] }
  0x13   :  { %135 = vmatprep.subr.mxu0 %v193_v0  ;;  %137 = vmatprep.mubr.msk.f32.mxu0 %vm194_vm0, %v193_v0  ;;  %v27_v2 = vld [vmem:[%s246_s0] sm:$0x3]  ;;  %s195_s28 = smov [#allocation5]   ;;  %vm113_vm2 = vcmask 58368  }
  0x14   :  { %136 = vmatpush3.xpose.msk.msra.mxu0 %vm36_vm1, %v28_v1  ;;  %v130_v3 = vld [vmem:[%s248_s2] ss:$0 sm:$0xff]  ;;  %s121_s1 = sshll.u32 %s195_s28, 4  ;;  %s122_s1 = int_to_ptr.vmem [resolvable:$true] %s121_s1 }
  0x15   :  { %s166_s29 = scalar_lea.vmem %s122_s1, 32  ;;  %p171_p9 = scmp.lt.s32.totalorder %s122_s1, %s122_s1 }
  0x16   :  { %p167_p8 = scmp.ne.s32.totalorder %s122_s1, %s166_s29  ;;  %p172_p10 = scmp.lt.s32.totalorder %s166_s29, %s166_s29 }
  0x17   :  { %138 = vmatmul.mubr.msk.f32.vlgmr.msra.gmra.mrb[0].mxu0 %vm36_vm1, %v27_v2 }
  0x18   :  { %p173_p11 = por %p172_p10, %p171_p9 }
  0x1a   :  { %p174_p12 = pnand %p173_p11, %p167_p8 }
  0xea   :  { %v109_v4 = vpop.f32.mrb[0].mxu0 }
  0xeb   :  { %v110_v5 = vadd.f32 %v130_v3, %v109_v4  ;;  %v139_v6 = vpop.f32.mrb[1].mxu0 }
  0xed   :  { %114 = vst.msk [vmem:[#allocation5] sm:$0x3] %vm113_vm2, %v110_v5 }
  0xee   :  { %177 = shalt.err (!%p174_p12)
}
  0xef   :  { %s178_s4 = scalar_lea.hbm %s249_s3, 32 }
  0xf0   :  { %p179_p13 = scmp.ne.s32.totalorder %s249_s3, %s178_s4  ;;  %p182_p0 = scmp.lt.u32.totalorder %s178_s4, %s249_s3 }
  0xf2   :  { %p184_p1 = pnand %p182_p0, %p179_p13 }
  0xf4   :  { %187 = shalt.err (!%p184_p1)
}
  0xf5   :  { %124 = dma.vmem_to_hbm [thread:$0]  %s122_s1, 32, %s249_s3, [#allocation4]  }
  0xf6   :  { %190 = dma.done.wait [#allocation4], 32  }
  0xf7   :  { %191 = vsyncadd [#allocation4], 4294967264 }
  0xf8   :  { %128 = vsyncpa [#allocation3], 1 }
  0xf9   :  { %129 = vsyncpa [#allocation4], 1 }

</bundles_post_ra>
